<compile_context>
chip_gen: v7x
topology: tpu7x:2x2x1
jax: 0.10.0
libtpu: 0.0.40
codegen_flags: <defaults>
</compile_context>

<pallas_src>
import functools

import jax
import jax.numpy as jnp
from jax.experimental import pallas as pl
from jax.experimental.pallas import tpu as pltpu


def _round_up(x, m):
    return ((x + m - 1) // m) * m


def _rectified_softmax_kernel(x_ref, o_ref, *, W, negative_slope, rectify_high):
    x = x_ref[...]
    if x.dtype != jnp.float32:
        x = x.astype(jnp.float32)
    tm, L = x.shape

    if W == L:
        # Reduction spans the whole lane dimension of the block.
        mean = jnp.mean(x, axis=-1, keepdims=True)                 # (tm, 1)
    else:
        # Packed layout: L == g * W; each block row holds g logical rows, each
        # occupying an aligned W-lane segment.  Butterfly all-reduce within each
        # segment using cyclic lane rolls.  Rolling the lane-index vector tells
        # us which roll stays inside the segment (direction-agnostic wrap).
        lane = jax.lax.broadcasted_iota(jnp.int32, (1, L), 1)      # (1, L)
        seg_start = lane - (lane & (W - 1))                        # first lane of each segment
        s = x
        shift = 1
        while shift < W:                                           # unrolled at trace time
            alt = (shift - W) % L                                  # wrap-around shift
            src = pltpu.roll(lane, shift, axis=1)                  # source lane of roll(., shift)
            in_seg = jnp.logical_and(src >= seg_start, src < seg_start + W)
            sel = jnp.where(in_seg, 1.0, 0.0)                      # (1, L) f32, broadcasts over rows
            ra = pltpu.roll(s, shift, axis=1)
            rb = pltpu.roll(s, alt, axis=1)
            s = s + ra * sel + rb * (1.0 - sel)
            shift *= 2
        mean = s * (1.0 / W)                                       # segment mean in every lane

    y = 1.0 + x - mean                                             # first-order softmax approx
    y = jnp.where(y >= 0.0, y, negative_slope * y)                 # LeakyReLU
    if rectify_high:
        y = y - (1.0 - negative_slope) * jnp.maximum(y - 1.0, 0.0)
    o_ref[...] = y.astype(o_ref.dtype)


_VMEM_BUDGET_BYTES = 8 * 1024 * 1024   # double-buffered in+out target (safe on v5e/v6e/v7x)
_MAX_ROW_TILE = 2048                   # ~1 MiB f32 blocks at 128 lanes: past the BW sweet spot


def _choose_row_tile(n_rows, lane_width, itemsize):
    # Footprint: 2 buffers x (in + out) x tm x lane_width x itemsize
    per_row = 4 * lane_width * itemsize
    tm = max(8, _VMEM_BUDGET_BYTES // per_row)
    tm = min(tm, _MAX_ROW_TILE)
    tm = min(tm, _round_up(n_rows, 8))
    if n_rows > 8:
        # keep at least two grid steps so both v7x TensorCores get work
        tm = min(tm, _round_up(pl.cdiv(n_rows, 2), 8))
    tm = max(8, (tm // 8) * 8)
    return tm


def rectified_softmax(x, *, rectify_high=False, negative_slope=0.01):
    """Pallas TPU implementation of RectifiedSoftmax.forward (reduction over dim=-1)."""
    orig_shape = x.shape
    W = int(orig_shape[-1])
    R = 1
    for d in orig_shape[:-1]:
        R *= int(d)
    x2 = x.reshape(R, W)
    itemsize = jnp.dtype(x.dtype).itemsize

    # Pack g logical rows per kernel row when the reduction width is a small
    # power of two -> lane-dense blocks (last dim 128) and unmasked stores.
    pack = (W < 128) and (W & (W - 1) == 0)
    g = (128 // W) if pack else 1
    lane_width = g * W

    n_rows = pl.cdiv(R, g)                         # kernel rows needed
    tm = _choose_row_tile(n_rows, lane_width, itemsize)
    padded_rows = _round_up(n_rows, tm)
    grid = padded_rows // tm

    flat_rows_needed = padded_rows * g
    if flat_rows_needed != R:                      # fixed tile + zero-padded tail (no grid=1 fallback)
        x2 = jnp.pad(x2, ((0, flat_rows_needed - R), (0, 0)))
    xk = x2.reshape(padded_rows, lane_width)       # row-major: free reshape

    kernel = functools.partial(
        _rectified_softmax_kernel,
        W=W,
        negative_slope=float(negative_slope),
        rectify_high=bool(rectify_high),
    )

    bytes_accessed = 2 * padded_rows * lane_width * itemsize
    cost = pl.CostEstimate(
        flops=10 * padded_rows * lane_width,
        transcendentals=0,
        bytes_accessed=bytes_accessed,
    )

    outk = pl.pallas_call(
        kernel,
        out_shape=jax.ShapeDtypeStruct((padded_rows, lane_width), x.dtype),
        grid_spec=pltpu.PrefetchScalarGridSpec(
            num_scalar_prefetch=0,
            grid=(grid,),
            in_specs=[pl.BlockSpec((tm, lane_width), lambda i: (i, 0))],
            out_specs=pl.BlockSpec((tm, lane_width), lambda i: (i, 0)),
        ),
        compiler_params=pltpu.CompilerParams(
            dimension_semantics=("parallel",),
        ),
        cost_estimate=cost,
    )(xk)

    out2 = outk.reshape(flat_rows_needed, W)
    if flat_rows_needed != R:
        out2 = out2[:R]
    return out2.reshape(orig_shape)


def _reference(x, *, rectify_high=False, negative_slope=0.01):
    x = x.astype(jnp.float32)
    y = 1.0 + x - jnp.mean(x, axis=-1, keepdims=True)
    y = jnp.where(y >= 0.0, y, negative_slope * y)
    if rectify_high:
        y = y - (1.0 - negative_slope) * jnp.maximum(y - 1.0, 0.0)
    return y


if __name__ == "__main__":
    key = jax.random.PRNGKey(0)
    # NCHW activation: packed lane-dense path (W=16 -> 8 rows per 128-lane vreg)
    x_nchw = jax.random.normal(key, (2, 4, 16, 16), dtype=jnp.float32)
    # Wide last dim: unpacked path, full-lane mean reduce
    x_wide = jax.random.normal(jax.random.fold_in(key, 1), (2, 3, 8, 256), dtype=jnp.float32)
    # Ragged row count: exercises zero-padding of the packed rows
    x_ragged = jax.random.normal(jax.random.fold_in(key, 2), (3, 5, 7, 16), dtype=jnp.float32)

    ok = True
    for name, xin in (("nchw", x_nchw), ("wide", x_wide), ("ragged", x_ragged)):
        for rectify_high in (False, True):
            out = rectified_softmax(xin, rectify_high=rectify_high, negative_slope=0.01)
            out = jax.block_until_ready(out)
            ref = _reference(xin, rectify_high=rectify_high, negative_slope=0.01)
            if not jnp.allclose(out, ref, atol=1e-5, rtol=1e-5):
                ok = False
                err = float(jnp.max(jnp.abs(out - ref)))
                print(f"MISMATCH ({name}, rectify_high={rectify_high}): max abs err {err}")

    if ok:
        print("KERNEL_OK")
</pallas_src>

<mosaic_0001>
module attributes {stable_mosaic.version = 11 : i64} {
  func.func @_rectified_softmax_kernel(%arg0: i32, %arg1: memref<8x128xf32, #tpu.memory_space<vmem>>, %arg2: memref<8x128xf32, #tpu.memory_space<vmem>>) attributes {dimension_semantics = [#tpu.dimension_semantics<parallel>], iteration_bounds = array<i64: 2>, scalar_prefetch = 0 : i64, scratch_operands = 0 : i64, tpu.core_type = #tpu.core_type<tc>, window_params = [{transform_indices = @transform_0, window_bounds = array<i64: 8, 128>}, {transform_indices = @transform_1, window_bounds = array<i64: 8, 128>}]} {
    %c0 = arith.constant 0 : index
    %c0_0 = arith.constant 0 : index
    %0 = vector.load %arg1[%c0, %c0_0] : memref<8x128xf32, #tpu.memory_space<vmem>>, vector<8x128xf32>
    %1 = tpu.iota {dimensions = array<i32: 1>} : vector<1x128xi32>
    %c15_i32 = arith.constant 15 : i32
    %2 = vector.broadcast %c15_i32 : i32 to vector<1x128xi32>
    %3 = arith.andi %1, %2 : vector<1x128xi32>
    %4 = arith.subi %1, %3 : vector<1x128xi32>
    %c1_i32 = arith.constant 1 : i32
    %5 = tpu.dynamic_rotate %1 by %c1_i32 dim 1 : vector<1x128xi32>, i32 -> vector<1x128xi32>
    %6 = arith.cmpi sge, %5, %4 : vector<1x128xi32>
    %c16_i32 = arith.constant 16 : i32
    %7 = vector.broadcast %c16_i32 : i32 to vector<1x128xi32>
    %8 = arith.addi %4, %7 : vector<1x128xi32>
    %9 = arith.cmpi slt, %5, %8 : vector<1x128xi32>
    %10 = arith.andi %6, %9 : vector<1x128xi1>
    %cst = arith.constant 1.000000e+00 : f32
    %cst_1 = arith.constant 0.000000e+00 : f32
    %11 = vector.broadcast %cst : f32 to vector<1x128xf32>
    %12 = vector.broadcast %cst_1 : f32 to vector<1x128xf32>
    %13 = arith.select %10, %11, %12 : vector<1x128xi1>, vector<1x128xf32>
    %c1_i32_2 = arith.constant 1 : i32
    %14 = tpu.dynamic_rotate %0 by %c1_i32_2 dim 1 : vector<8x128xf32>, i32 -> vector<8x128xf32>
    %c113_i32 = arith.constant 113 : i32
    %15 = tpu.dynamic_rotate %0 by %c113_i32 dim 1 : vector<8x128xf32>, i32 -> vector<8x128xf32>
    %16 = vector.broadcast %13 : vector<1x128xf32> to vector<8x128xf32>
    %17 = arith.mulf %14, %16 : vector<8x128xf32>
    %18 = arith.addf %0, %17 : vector<8x128xf32>
    %cst_3 = arith.constant 1.000000e+00 : f32
    %19 = vector.broadcast %cst_3 : f32 to vector<1x128xf32>
    %20 = arith.subf %19, %13 : vector<1x128xf32>
    %21 = vector.broadcast %20 : vector<1x128xf32> to vector<8x128xf32>
    %22 = arith.mulf %15, %21 : vector<8x128xf32>
    %23 = arith.addf %18, %22 : vector<8x128xf32>
    %c2_i32 = arith.constant 2 : i32
    %24 = tpu.dynamic_rotate %1 by %c2_i32 dim 1 : vector<1x128xi32>, i32 -> vector<1x128xi32>
    %25 = arith.cmpi sge, %24, %4 : vector<1x128xi32>
    %c16_i32_4 = arith.constant 16 : i32
    %26 = vector.broadcast %c16_i32_4 : i32 to vector<1x128xi32>
    %27 = arith.addi %4, %26 : vector<1x128xi32>
    %28 = arith.cmpi slt, %24, %27 : vector<1x128xi32>
    %29 = arith.andi %25, %28 : vector<1x128xi1>
    %cst_5 = arith.constant 1.000000e+00 : f32
    %cst_6 = arith.constant 0.000000e+00 : f32
    %30 = vector.broadcast %cst_5 : f32 to vector<1x128xf32>
    %31 = vector.broadcast %cst_6 : f32 to vector<1x128xf32>
    %32 = arith.select %29, %30, %31 : vector<1x128xi1>, vector<1x128xf32>
    %c2_i32_7 = arith.constant 2 : i32
    %33 = tpu.dynamic_rotate %23 by %c2_i32_7 dim 1 : vector<8x128xf32>, i32 -> vector<8x128xf32>
    %c114_i32 = arith.constant 114 : i32
    %34 = tpu.dynamic_rotate %23 by %c114_i32 dim 1 : vector<8x128xf32>, i32 -> vector<8x128xf32>
    %35 = vector.broadcast %32 : vector<1x128xf32> to vector<8x128xf32>
    %36 = arith.mulf %33, %35 : vector<8x128xf32>
    %37 = arith.addf %23, %36 : vector<8x128xf32>
    %cst_8 = arith.constant 1.000000e+00 : f32
    %38 = vector.broadcast %cst_8 : f32 to vector<1x128xf32>
    %39 = arith.subf %38, %32 : vector<1x128xf32>
    %40 = vector.broadcast %39 : vector<1x128xf32> to vector<8x128xf32>
    %41 = arith.mulf %34, %40 : vector<8x128xf32>
    %42 = arith.addf %37, %41 : vector<8x128xf32>
    %c4_i32 = arith.constant 4 : i32
    %43 = tpu.dynamic_rotate %1 by %c4_i32 dim 1 : vector<1x128xi32>, i32 -> vector<1x128xi32>
    %44 = arith.cmpi sge, %43, %4 : vector<1x128xi32>
    %c16_i32_9 = arith.constant 16 : i32
    %45 = vector.broadcast %c16_i32_9 : i32 to vector<1x128xi32>
    %46 = arith.addi %4, %45 : vector<1x128xi32>
    %47 = arith.cmpi slt, %43, %46 : vector<1x128xi32>
    %48 = arith.andi %44, %47 : vector<1x128xi1>
    %cst_10 = arith.constant 1.000000e+00 : f32
    %cst_11 = arith.constant 0.000000e+00 : f32
    %49 = vector.broadcast %cst_10 : f32 to vector<1x128xf32>
    %50 = vector.broadcast %cst_11 : f32 to vector<1x128xf32>
    %51 = arith.select %48, %49, %50 : vector<1x128xi1>, vector<1x128xf32>
    %c4_i32_12 = arith.constant 4 : i32
    %52 = tpu.dynamic_rotate %42 by %c4_i32_12 dim 1 : vector<8x128xf32>, i32 -> vector<8x128xf32>
    %c116_i32 = arith.constant 116 : i32
    %53 = tpu.dynamic_rotate %42 by %c116_i32 dim 1 : vector<8x128xf32>, i32 -> vector<8x128xf32>
    %54 = vector.broadcast %51 : vector<1x128xf32> to vector<8x128xf32>
    %55 = arith.mulf %52, %54 : vector<8x128xf32>
    %56 = arith.addf %42, %55 : vector<8x128xf32>
    %cst_13 = arith.constant 1.000000e+00 : f32
    %57 = vector.broadcast %cst_13 : f32 to vector<1x128xf32>
    %58 = arith.subf %57, %51 : vector<1x128xf32>
    %59 = vector.broadcast %58 : vector<1x128xf32> to vector<8x128xf32>
    %60 = arith.mulf %53, %59 : vector<8x128xf32>
    %61 = arith.addf %56, %60 : vector<8x128xf32>
    %c8_i32 = arith.constant 8 : i32
    %62 = tpu.dynamic_rotate %1 by %c8_i32 dim 1 : vector<1x128xi32>, i32 -> vector<1x128xi32>
    %63 = arith.cmpi sge, %62, %4 : vector<1x128xi32>
    %c16_i32_14 = arith.constant 16 : i32
    %64 = vector.broadcast %c16_i32_14 : i32 to vector<1x128xi32>
    %65 = arith.addi %4, %64 : vector<1x128xi32>
    %66 = arith.cmpi slt, %62, %65 : vector<1x128xi32>
    %67 = arith.andi %63, %66 : vector<1x128xi1>
    %cst_15 = arith.constant 1.000000e+00 : f32
    %cst_16 = arith.constant 0.000000e+00 : f32
    %68 = vector.broadcast %cst_15 : f32 to vector<1x128xf32>
    %69 = vector.broadcast %cst_16 : f32 to vector<1x128xf32>
    %70 = arith.select %67, %68, %69 : vector<1x128xi1>, vector<1x128xf32>
    %c8_i32_17 = arith.constant 8 : i32
    %71 = tpu.dynamic_rotate %61 by %c8_i32_17 dim 1 : vector<8x128xf32>, i32 -> vector<8x128xf32>
    %c120_i32 = arith.constant 120 : i32
    %72 = tpu.dynamic_rotate %61 by %c120_i32 dim 1 : vector<8x128xf32>, i32 -> vector<8x128xf32>
    %73 = vector.broadcast %70 : vector<1x128xf32> to vector<8x128xf32>
    %74 = arith.mulf %71, %73 : vector<8x128xf32>
    %75 = arith.addf %61, %74 : vector<8x128xf32>
    %cst_18 = arith.constant 1.000000e+00 : f32
    %76 = vector.broadcast %cst_18 : f32 to vector<1x128xf32>
    %77 = arith.subf %76, %70 : vector<1x128xf32>
    %78 = vector.broadcast %77 : vector<1x128xf32> to vector<8x128xf32>
    %79 = arith.mulf %72, %78 : vector<8x128xf32>
    %80 = arith.addf %75, %79 : vector<8x128xf32>
    %cst_19 = arith.constant 6.250000e-02 : f32
    %81 = vector.broadcast %cst_19 : f32 to vector<8x128xf32>
    %82 = arith.mulf %80, %81 : vector<8x128xf32>
    %cst_20 = arith.constant 1.000000e+00 : f32
    %83 = vector.broadcast %cst_20 : f32 to vector<8x128xf32>
    %84 = arith.addf %83, %0 : vector<8x128xf32>
    %85 = arith.subf %84, %82 : vector<8x128xf32>
    %cst_21 = arith.constant 0.000000e+00 : f32
    %86 = vector.broadcast %cst_21 : f32 to vector<8x128xf32>
    %87 = arith.cmpf oge, %85, %86 : vector<8x128xf32>
    %cst_22 = arith.constant 0.00999999977 : f32
    %88 = vector.broadcast %cst_22 : f32 to vector<8x128xf32>
    %89 = arith.mulf %88, %85 : vector<8x128xf32>
    %90 = arith.select %87, %85, %89 : vector<8x128xi1>, vector<8x128xf32>
    %c0_23 = arith.constant 0 : index
    %c0_24 = arith.constant 0 : index
    %91 = vector.load %arg2[%c0_23, %c0_24] : memref<8x128xf32, #tpu.memory_space<vmem>>, vector<8x128xf32>
    tpu.vector_store %arg2[%c0_23, %c0_24], %90 {strides = array<i32>} : memref<8x128xf32, #tpu.memory_space<vmem>>, vector<8x128xf32>,
    return
  }
  func.func @transform_0(%arg0: i32) -> (i32, i32) {
    %c0_i32 = arith.constant 0 : i32
    %c0_i32_0 = arith.constant 0 : i32
    return %arg0, %c0_i32 : i32, i32
  }
  func.func @transform_1(%arg0: i32) -> (i32, i32) {
    %c0_i32 = arith.constant 0 : i32
    %c0_i32_0 = arith.constant 0 : i32
    return %arg0, %c0_i32 : i32, i32
  }
}

</mosaic_0001>

<bundles_post_ra>
// kernel: tpu_custom_call.1
= control target key start
LH: loop header
LB: loop body
LE: loop exit
PB: predicated region body
PF: predicated region fallthrough
CT: control target
= control target key end

     0   :  { %6 = vsyncpa [#allocation3], 0  ;;  %s695_s0 = inlined_call_operand.hbm [shape: f32[16,128], index: 0, kind: input, shape index: {}]   ;;  %s696_s1 = inlined_call_operand.hbm [shape: f32[16,128], index: 1, kind: output, shape index: {}]  }
   0x1   :  { %8 = vsyncpa [#allocation3 + $0x1], 0 }
   0x2   :  { %9 = vsyncpa [#allocation4], 0 }
   0x3   :  { %11 = vsyncpa [#allocation4 + $0x1], 0  ;;  %s507_s6 = smov 0   ;;  %s509_s7 = smov 0  }
   0x4   :  { %s511_s8 = smov 0   ;;  %s513_s9 = smov 0  }
   0x5 LB: > { %s528_s10 = sadd.s32 4294967295, %s484_s9   ;;  %s321_s11 = sadd.s32 4294967294, %s484_s9   ;;  %s484_s9 = sphi %s513_s9, %s711_s9   ;;  %s480_s8 = sphi %s511_s8, %s710_s8   ;;  %s476_s7 = sphi %s509_s7, %s709_s7   ;;  %s472_s6 = sphi %s507_s6, %s708_s6  }
   0x6   : > { %s532_s12 = sadd.s32 1, %s484_s9   ;;  %s24_s13 = sadd.s32 1, %s480_s8 }
   0x7   : > { %s21_s14 = ssub.s32 %s484_s9, %s532_s12  ;;  %p31_p0 = scmp.ne.s32.totalorder %s480_s8, %s476_s7 }
   0x8   : > { %p22_p1 = scmp.eq.s32.totalorder %s21_s14, 0  ;;  %p32_p2 = scmp.eq.s32.totalorder %s484_s9, 0 }
   0x9   : > { %p37_p3 = scmp.ne.s32.totalorder %s476_s7, %s472_s6  ;;  %p38_p4 = scmp.eq.s32.totalorder %s528_s10, 0 }
   0xa   : > { %s544_s15 = scalar_select %p22_p1, %s480_s8, %s24_s13  }
   0xb   : > { %p546_p5 = por %p32_p2, %p31_p0  ;;  %p550_p6 = por %p38_p4, %p37_p3 }
   0xc   : > { %p61_p7 = scmp.eq.s32.totalorder %s528_s10, 1  ;;  %p67_p8 = scmp.eq.s32.totalorder %s321_s11, 1 }
   0xd   : > { %p345_p10 = scmp.lt.s32.totalorder %s484_s9, 2  ;;  %s87_s20 = sand.u32 1, %s480_s8  }
   0xe   : > { %p557_p11 = por %p61_p7, %p31_p0  ;;  %p561_p12 = por %p67_p8, %p37_p3 }
   0xf   : > { %s325_s21 = sshll.u32 %s484_s9, 7  ;;  %s324_s22 = sshll.u32 %s87_s20, 3 }
  0x10   : > { %s700_s18 = scalar_select %p557_p11, 1, 0 }
  0x11   : > { %s701_s19 = scalar_select %p561_p12, 1, 0 }
  0x12   : > { %s570_s25 = scalar_lea.hbm %s695_s0, %s325_s21  ;;  %s91_s26 = scalar_lea.vmem [#allocation2], %s324_s22 }
  0x13   : > { %s98_s27 = sshll.u32 %s91_s26, 4  ;;  %p574_p13 = pnand %p345_p10, %p546_p5  ;;  %s578_s27 = int_to_ptr.vmem [resolvable:$true] %s98_s27 }
  0x14   : > { %s88_s29 = scalar_lea.sflag [#allocation3], %s87_s20  ;;  %s388_s30 = scalar_lea.hbm %s570_s25, 128 }
  0x15   : > { %p389_p2 = scmp.ne.s32.totalorder %s570_s25, %s388_s30  ;;  %p390_p3 = pneg %p574_p13 }
  0x16   : > { %s393_s4 = scalar_lea.hbm %s695_s0, 256  ;;  %p394_p5 = scmp.lt.u32.totalorder %s570_s25, %s695_s0 }
  0x17   : > { %p391_p4 = pnand %p390_p3, %p389_p2  ;;  %p395_p8 = scmp.lt.u32.totalorder %s393_s4, %s388_s30 }
  0x18   : > { %p397_p9 = scmp.lt.u32.totalorder %s388_s30, %s570_s25 }
  0x19   : > { %p392_p7 = pneg %p391_p4  ;;  %p396_p10 = por %p395_p8, %p394_p5 }
  0x1b   : > { %p398_p0 = por %p397_p9, %p396_p10 }
  0x1d   : > { %p399_p1 = pnand %p398_p0, %p392_p7 }
  0x1f   : > { %402 = shalt.err (!%p399_p1)
}
  0x20   : > { %s403_s13 = scalar_lea.vmem %s578_s27, 128  ;;  %s486_s14 = smov [#allocation2]  }
  0x21   : > { %p404_p2 = scmp.ne.s32.totalorder %s578_s27, %s403_s13  ;;  %s408_s16 = sshll.u32 %s486_s14, 4  ;;  %s409_s16 = int_to_ptr.vmem [resolvable:$false] %s408_s16 }
  0x22   : > { %s410_s20 = scalar_lea.vmem %s409_s16, 256  ;;  %p411_p11 = scmp.lt.s32.totalorder %s578_s27, %s409_s16 }
  0x23   : > { %p406_p4 = pnand %p404_p2, %p390_p3  ;;  %p412_p5 = scmp.lt.s32.totalorder %s410_s20, %s403_s13 }
  0x25   : > { %p407_p12 = pneg %p406_p4  ;;  %p413_p8 = por %p412_p5, %p411_p11 }
  0x27   : > { %p414_p9 = pnand %p413_p8, %p407_p12 }
  0x29   : > { %417 = shalt.err (!%p414_p9)
}
  0x2a   : > { %340 = dma.hbm_to_vmem [thread:$0]  (!%p574_p13), %s570_s25, 128, %s578_s27, %s88_s29  }
  0x2b   : > { %p703_p0 = scmp.lt.s32.totalorder %s484_s9, 3  ;;  %p704_p1 = scmp.ge.s32.totalorder %s484_s9, 1 }
  0x2d   : > { %p104_p3 = pnand %p704_p1, %p703_p0 }
  0x2e   : > { %s612_s21 = sand.u32 (!%p104_p3), 1, %s476_s7  }
  0x2f   : > { %107 = sbr.rel (%p104_p3) target bundleno = 569 (0x239), region = 24  ;;  %s327_s22 = sshll.u32 (!%p104_p3), %s612_s21, 3 }
  0x30   : > { %s110_s23 = scalar_lea.sflag (!%p104_p3), [#allocation3], %s612_s21  ;;  %s113_s24 = scalar_lea.vmem (!%p104_p3), [#allocation2], %s327_s22 }
  0x36   : > { %463 = dma.done.wait (%p550_p6), %s110_s23, 128  }
  0x37   : > { %465 = vsyncadd (%p550_p6), %s110_s23, 4294967168  ;;  %v133_v0 = vlaneseq  ;;  %s487_s25 = smov 1   ;;  %v622_v2 = vld [vmem:[%s113_s24] sm:$0xff]  ;;  %s488_s26 = smov 113   ;;  %v490_v9 = vmov 0.0  }
  0x38   : > { %146 = vrot.lane.b32.xlu1 %v622_v2, %s488_s26  ;;  %s489_s27 = smov 2   ;;  %s491_s17 = smov 114   ;;  %v231_v52 = vadd.f32 1.0, %v622_v2 }
  0x39   : > { %v134_v1 = vand.u32 127, %v133_v0  ;;  %v149_v5 = vshrl.u32 %v133_v0, 7  ;;  %s492_s28 = smov 4   ;;  %s493_s29 = smov 116  }
  0x3a   : > { %s494_s30 = smov 8   ;;  %s495_s2 = smov 120  }
  0x3b   : > { %137 = vrot.lane.b32.xlu0 %v134_v1, %s487_s25  ;;  %v135_v3 = vand.u32 15, %v134_v1  ;;  %v629_v7 = vsub.s32 0, %v149_v5  ;;  %s330_s3 = sshll.u32 %s528_s10, 7  ;;  %s131_s4 = scalar_lea.vmem [#allocation5], %s327_s22 }
  0x3c   : > { %161 = vrot.lane.b32.xlu1 %v134_v1, %s489_s27  ;;  %s251_s5 = sshll.u32 %s131_s4, 4  ;;  %s651_s14 = scalar_lea.hbm %s696_s1, %s330_s3  ;;  %s653_s5 = int_to_ptr.vmem [resolvable:$true] %s251_s5 }
  0x3d   : > { %v626_v4 = vsub.s32 %v134_v1, %v135_v3  ;;  %s238_s16 = scalar_lea.sflag [#allocation4], %s612_s21  ;;  %s418_s20 = scalar_lea.vmem %s653_s5, 128 }
  0x3e   : > { %p419_p6 = scmp.ne.s32.totalorder %s653_s5, %s418_s20  ;;  %p705_p11 = scmp.ne.s32.totalorder %s700_s18, 0 }
  0x3f   : > { %144 = vrot.lane.b32.xlu0 %v622_v2, %s487_s25  ;;  %v140_v6 = vadd.s32 16, %v626_v4  ;;  %s496_s10 = smov [#allocation5]  }
  0x40   : > { %p420_p12 = pnand %p419_p6, %p705_p11  ;;  %s422_s22 = sshll.u32 %s496_s10, 4  ;;  %s423_s22 = int_to_ptr.vmem [resolvable:$false] %s422_s22 }
  0x41   : > { %s424_s23 = scalar_lea.vmem %s423_s22, 256  ;;  %p425_p7 = scmp.lt.s32.totalorder %s653_s5, %s423_s22 }
  0x42   : > { %p421_p13 = pneg %p420_p12  ;;  %p426_p10 = scmp.lt.s32.totalorder %s424_s23, %s418_s20 }
  0x44   : > { %p427_p2 = por %p426_p10, %p425_p7 }
  0x46   : > { %p428_p4 = pnand %p427_p2, %p421_p13 }
  0xaa   : > { %v147_v14 = vpop.permute.xlu1 %146 }
  0xad   : > { %v138_v8 = vpop.permute.xlu0 %137 }
  0xae   : > { %vm139_vm0 = vcmp.ge.s32.totalorder %v138_v8, %v626_v4  ;;  %vm141_vm1 = vcmp.lt.s32.totalorder %v138_v8, %v140_v6  ;;  %v162_v20 = vpop.permute.xlu1 %161 }
  0xaf   : > { %vm142_vm2 = vmand %vm139_vm0, %vm141_vm1  ;;  %vm163_vm3 = vcmp.ge.s32.totalorder %v162_v20, %v626_v4  ;;  %vm164_vm4 = vcmp.lt.s32.totalorder %v162_v20, %v140_v6 }
  0xb0   : > { %v143_v10 = vsel %vm142_vm2, 1.0, %v490_v9  ;;  %vm165_vm5 = vmand %vm163_vm3, %vm164_vm4 }
  0xb1   : > { %v151_v11 = vrot.slane %v143_v10, %v629_v7  ;;  %v145_v12 = vpop.permute.xlu0 %144  ;;  %v154_v13 = vsub.f32 1.0, %v143_v10  ;;  %v166_v21 = vsel %vm165_vm5, 1.0, %v490_v9 }
  0xb2   : > { %v177_v22 = vsub.f32 1.0, %v166_v21  ;;  %v174_v23 = vrot.slane %v166_v21, %v629_v7 }
  0xb3   : > { %v152_v15 = vmul.f32 %v151_v11, %v145_v12  ;;  %v158_v16 = vrot.slane %v154_v13, %v629_v7 }
  0xb4   : > { %v181_v24 = vrot.slane %v177_v22, %v629_v7 }
  0xb5   : > { %v153_v17 = vadd.f32 %v152_v15, %v622_v2  ;;  %v159_v18 = vmul.f32 %v158_v16, %v147_v14 }
  0xb7   : > { %v160_v19 = vadd.f32 %v159_v18, %v153_v17 }
  0xb9   : > { %169 = vrot.lane.b32.xlu1 %v160_v19, %s491_s17  ;;  %167 = vrot.lane.b32.xlu0 %v160_v19, %s489_s27 }
  0xbd   : > { %184 = vrot.lane.b32.xlu0 %v134_v1, %s492_s28 }
 0x12b   : > { %v170_v25 = vpop.permute.xlu1 %169  ;;  %v168_v26 = vpop.permute.xlu0 %167 }
 0x12c   : > { %v175_v27 = vmul.f32 %v174_v23, %v168_v26  ;;  %v182_v28 = vmul.f32 %v181_v24, %v170_v25 }
 0x12e   : > { %v176_v29 = vadd.f32 %v175_v27, %v160_v19 }
 0x12f   : > { %v185_v31 = vpop.permute.xlu0 %184 }
 0x130   : > { %v183_v30 = vadd.f32 %v182_v28, %v176_v29  ;;  %vm186_vm6 = vcmp.ge.s32.totalorder %v185_v31, %v626_v4  ;;  %vm187_vm7 = vcmp.lt.s32.totalorder %v185_v31, %v140_v6 }
 0x131   : > { %vm188_vm8 = vmand %vm186_vm6, %vm187_vm7 }
 0x132   : > { %192 = vrot.lane.b32.xlu0 %v183_v30, %s493_s29  ;;  %190 = vrot.lane.b32.xlu1 %v183_v30, %s492_s28  ;;  %v189_v32 = vsel %vm188_vm8, 1.0, %v490_v9 }
 0x133   : > { %v200_v33 = vsub.f32 1.0, %v189_v32  ;;  %v197_v34 = vrot.slane %v189_v32, %v629_v7 }
 0x135   : > { %v204_v35 = vrot.slane %v200_v33, %v629_v7 }
 0x136   : > { %207 = vrot.lane.b32.xlu1 %v134_v1, %s494_s30 }
 0x1a4   : > { %v191_v36 = vpop.permute.xlu1 %190  ;;  %v193_v37 = vpop.permute.xlu0 %192 }
 0x1a5   : > { %v198_v38 = vmul.f32 %v197_v34, %v191_v36  ;;  %v205_v40 = vmul.f32 %v204_v35, %v193_v37 }
 0x1a7   : > { %v199_v39 = vadd.f32 %v198_v38, %v183_v30 }
 0x1a8   : > { %v208_v42 = vpop.permute.xlu1 %207 }
 0x1a9   : > { %v206_v41 = vadd.f32 %v205_v40, %v199_v39  ;;  %vm209_vm9 = vcmp.ge.s32.totalorder %v208_v42, %v626_v4  ;;  %vm210_vm10 = vcmp.lt.s32.totalorder %v208_v42, %v140_v6 }
 0x1aa   : > { %vm211_vm11 = vmand %vm209_vm9, %vm210_vm10 }
 0x1ab   : > { %215 = vrot.lane.b32.xlu1 %v206_v41, %s495_s2  ;;  %213 = vrot.lane.b32.xlu0 %v206_v41, %s494_s30  ;;  %v212_v43 = vsel %vm211_vm11, 1.0, %v490_v9 }
 0x1ac   : > { %v223_v44 = vsub.f32 1.0, %v212_v43  ;;  %v220_v45 = vrot.slane %v212_v43, %v629_v7 }
 0x1ae   : > { %v227_v46 = vrot.slane %v223_v44, %v629_v7 }
 0x21d   : > { %v216_v47 = vpop.permute.xlu1 %215  ;;  %v214_v48 = vpop.permute.xlu0 %213 }
 0x21e   : > { %v221_v49 = vmul.f32 %v220_v45, %v214_v48  ;;  %v228_v50 = vmul.f32 %v227_v46, %v216_v47 }
 0x220   : > { %v222_v51 = vadd.f32 %v221_v49, %v206_v41 }
 0x222   : > { %v229_v53 = vadd.f32 %v228_v50, %v222_v51 }
 0x224   : > { %v230_v54 = vmul.f32 0.0625, %v229_v53 }
 0x226   : > { %v232_v55 = vsub.f32 %v231_v52, %v230_v54 }
 0x228   : > { %v234_v56 = vmul.f32 0.01, %v232_v55  ;;  %vm233_vm12 = vcmp.ge.f32.partialorder %v232_v55, 0.0 }
 0x22a   : > { %v235_v57 = vsel %vm233_vm12, %v232_v55, %v234_v56 }
 0x22b   : > { %236 = vst [vmem:[%s131_s4] sm:$0xff] %v235_v57 }
 0x22c   : > { %431 = shalt.err (!%p428_p4)
}
 0x22d   : > { %s432_s21 = scalar_lea.hbm %s651_s14, 128  ;;  %s436_s26 = scalar_lea.hbm %s696_s1, 256 }
 0x22e   : > { %p433_p5 = scmp.ne.s32.totalorder %s651_s14, %s432_s21  ;;  %p437_p0 = scmp.lt.u32.totalorder %s651_s14, %s696_s1 }
 0x22f   : > { %p438_p1 = scmp.lt.u32.totalorder %s436_s26, %s432_s21  ;;  %p440_p6 = scmp.lt.u32.totalorder %s432_s21, %s651_s14 }
 0x230   : > { %p434_p8 = pnand %p433_p5, %p705_p11 }
 0x231   : > { %p439_p3 = por %p438_p1, %p437_p0 }
 0x232   : > { %p435_p9 = pneg %p434_p8 }
 0x233   : > { %p441_p12 = por %p440_p6, %p439_p3 }
 0x235   : > { %p442_p13 = pnand %p441_p12, %p435_p9 }
 0x237   : > { %445 = shalt.err (!%p442_p13)
}
 0x238   : > { %335 = dma.vmem_to_hbm [thread:$0]  (%p705_p11), %s653_s5, 128, %s651_s14, %s238_s16  }
 0x239 PF: > { %s263_s28 = sand.u32 1, %s472_s6   ;;  %p706_p7 = scmp.ne.s32.totalorder %s701_s19, 0 }
 0x23a   : > { %p707_p10 = scmp.ge.s32.totalorder %s484_s9, 2  ;;  %s264_s29 = scalar_lea.sflag [#allocation4], %s263_s28 }
 0x23c   : > { %p342_p2 = pnand %p707_p10, %p706_p7 }
 0x23e   : > { %467 = dma.done.wait (!%p342_p2), %s264_s29, 128  }
 0x23f   : > { %469 = vsyncadd (!%p342_p2), %s264_s29, 4294967168  ;;  %p14_p4 = scmp.ge.s32.totalorder %s532_s12, 4   ;;  %s708_s6 = smov %s476_s7 }
 0x240   : > { %s709_s7 = smov %s480_s8  ;;  %s710_s8 = smov %s544_s15 }
 0x241   : > { %s711_s9 = smov %s532_s12  ;;  %16 = sbr.rel (!%p14_p4) target bundleno = 5 (0x5), region = 69 }
 0x248   :  { %269 = vsyncpa [#allocation3], 1 }
 0x249   :  { %271 = vsyncpa [#allocation3 + $0x1], 1 }
 0x24a   :  { %272 = vsyncpa [#allocation4], 1 }
 0x24b   :  { %274 = vsyncpa [#allocation4 + $0x1], 1 }

</bundles_post_ra>
